<compile_context>
chip_gen: v6e
topology: v6e:2x2x1
jax: 0.10.0
libtpu: 0.0.40
codegen_flags: <defaults>
</compile_context>

<pallas_src>
import jax
import jax.numpy as jnp
from jax.experimental import pallas as pl
from jax.experimental.pallas import tpu as pltpu

# ---- small synthetic config (stands in for dinov2-base: 768-dim, 14x14 patches) ----
B = 2            # batch
C_IN = 3         # image channels
IMG = 16         # spatial size
PATCH = 4        # patch size
P = (IMG // PATCH) ** 2          # number of patch tokens (seq len) = 16
PD = C_IN * PATCH * PATCH        # flattened patch dim = 48
D = 32           # "hidden_size" of the backbone (dinov2-base would be 768)
H = 64           # classifier[0] output dim
NUM_CLASSES = 16 # classifier[2] output dim

LANE = 128       # pad every feature axis to one full vreg lane width
SUB = 8          # pad small sublane axes (batch rows) to one full sublane tile


def dino_classifier_kernel(patches_ref, pool_ref, we_ref, be_ref,
                           w1_ref, b1_ref, w2_ref, b2_ref, out_ref):
    # patches_ref: (B*P, LANE)  -- all batch rows' patch tokens, lane-padded.
    # Synthetic backbone: patch-embedding matmul over the whole batch at once.
    tokens = jnp.dot(patches_ref[...], we_ref[...],
                     preferred_element_type=jnp.float32) + be_ref[...]      # (B*P, LANE)
    # TODO(synk): the pretrained DINOv2 transformer stack (attention blocks,
    # CLS token, layernorms) is an external checkpointed model and is not
    # reproduced here; `tokens` stands in for outputs.last_hidden_state
    # flattened over (batch, seq).

    # feats = last_hidden_state.mean(dim=1), computed as an MXU matmul with a
    # constant pooling matrix (pool[b, b*P:(b+1)*P] = 1/P).  Avoids the
    # cross-sublane XLU reduction of jnp.mean(axis=seq).
    feats = jnp.dot(pool_ref[...], tokens,
                    preferred_element_type=jnp.float32)                     # (SUB, LANE)

    # classifier[0]: Linear (batched over all rows)
    inter = jnp.dot(feats, w1_ref[...],
                    preferred_element_type=jnp.float32) + b1_ref[...]       # (SUB, LANE)
    # classifier[1]: activation (ReLU assumed; swap for GELU if the torch head uses it)
    act = jnp.maximum(inter, 0.0)
    # classifier[2]: Linear -> logits
    logits = jnp.dot(act, w2_ref[...],
                     preferred_element_type=jnp.float32) + b2_ref[...]      # (SUB, LANE)

    out_ref[...] = logits.astype(out_ref.dtype)


def dino_classifier_forward(x_nchw, params):
    """x_nchw: [B, C, IMG, IMG] float32 (NCHW). Returns logits [B, NUM_CLASSES]."""
    we, be, w1, b1, w2, b2 = params
    b, c, h, w = x_nchw.shape
    gh, gw = h // PATCH, w // PATCH
    p = gh * gw
    pd = c * PATCH * PATCH
    bp = b * p                       # total token rows (32) -- already 8-aligned
    b_pad = SUB                      # pad batch rows to a full sublane tile

    # Glue: NCHW image -> patch tokens, flattened over (batch, seq), lane-padded.
    patches = x_nchw.reshape(b, c, gh, PATCH, gw, PATCH)
    patches = patches.transpose(0, 2, 4, 1, 3, 5).reshape(bp, pd)
    patches_p = jnp.pad(patches, ((0, 0), (0, LANE - pd)))                  # (B*P, 128)

    # Zero-pad all weights/biases to lane-dense 128-wide operands (layout only).
    we_p = jnp.pad(we, ((0, LANE - pd), (0, LANE - D)))                     # (128, 128)
    be_p = jnp.pad(be, ((0, 0), (0, LANE - D)))                             # (1, 128)
    w1_p = jnp.pad(w1, ((0, LANE - D), (0, LANE - H)))                      # (128, 128)
    b1_p = jnp.pad(b1, ((0, 0), (0, LANE - H)))                             # (1, 128)
    w2_p = jnp.pad(w2, ((0, LANE - H), (0, LANE - NUM_CLASSES)))            # (128, 128)
    b2_p = jnp.pad(b2, ((0, 0), (0, LANE - NUM_CLASSES)))                   # (1, 128)

    # Constant pooling matrix implementing mean over each row's P tokens,
    # padded to a full 8-row sublane tile (padded rows are zero -> sliced away).
    pool = jnp.repeat(jnp.eye(b, dtype=jnp.float32), p, axis=1) / p         # (B, B*P)
    pool_p = jnp.pad(pool, ((0, b_pad - b), (0, 0)))                        # (8, B*P)

    logits_pad = pl.pallas_call(
        dino_classifier_kernel,
        out_shape=jax.ShapeDtypeStruct((b_pad, LANE), jnp.float32),
        grid_spec=pltpu.PrefetchScalarGridSpec(
            num_scalar_prefetch=0,
            grid=(1,),  # single invocation: whole batch in one step
            in_specs=[
                pl.BlockSpec((bp, LANE), lambda i: (0, 0)),      # all patch tokens
                pl.BlockSpec((b_pad, bp), lambda i: (0, 0)),     # mean-pool matrix
                pl.BlockSpec((LANE, LANE), lambda i: (0, 0)),    # patch-embed W (padded)
                pl.BlockSpec((1, LANE), lambda i: (0, 0)),       # patch-embed b
                pl.BlockSpec((LANE, LANE), lambda i: (0, 0)),    # classifier[0] W^T
                pl.BlockSpec((1, LANE), lambda i: (0, 0)),       # classifier[0] b
                pl.BlockSpec((LANE, LANE), lambda i: (0, 0)),    # classifier[2] W^T
                pl.BlockSpec((1, LANE), lambda i: (0, 0)),       # classifier[2] b
            ],
            out_specs=pl.BlockSpec((b_pad, LANE), lambda i: (0, 0)),  # (8,128) slab
        ),
        compiler_params=pltpu.CompilerParams(
            dimension_semantics=("arbitrary",)),
    )(patches_p, pool_p, we_p, be_p, w1_p, b1_p, w2_p, b2_p)

    # Un-pad: real logits live in the first B rows / NUM_CLASSES lanes.
    return logits_pad[:b, :NUM_CLASSES]


def _reference(x_nchw, params):
    we, be, w1, b1, w2, b2 = params
    b, c, h, w = x_nchw.shape
    gh, gw = h // PATCH, w // PATCH
    patches = x_nchw.reshape(b, c, gh, PATCH, gw, PATCH)
    patches = patches.transpose(0, 2, 4, 1, 3, 5).reshape(b, gh * gw, c * PATCH * PATCH)
    tokens = patches @ we + be                      # (B, P, D)
    feats = tokens.mean(axis=1)                     # (B, D)
    inter = feats @ w1 + b1
    act = jnp.maximum(inter, 0.0)
    return act @ w2 + b2


if __name__ == "__main__":
    key = jax.random.PRNGKey(0)
    ks = jax.random.split(key, 7)

    x = jax.random.normal(ks[0], (B, C_IN, IMG, IMG), jnp.float32)

    # Deterministic synthetic parameter init (PyTorch Linear stores (out,in);
    # we pre-transpose so the kernel does x @ W^T as x @ w).
    we = 0.05 * jax.random.normal(ks[1], (PD, D), jnp.float32)        # patch embed
    be = 0.05 * jax.random.normal(ks[2], (1, D), jnp.float32)
    w1_torch = 0.05 * jax.random.normal(ks[3], (H, D), jnp.float32)   # Linear(D, H).weight
    b1 = 0.05 * jax.random.normal(ks[4], (1, H), jnp.float32)
    w2_torch = 0.05 * jax.random.normal(ks[5], (NUM_CLASSES, H), jnp.float32)
    b2 = 0.05 * jax.random.normal(ks[6], (1, NUM_CLASSES), jnp.float32)

    params = (we, be, w1_torch.T, b1, w2_torch.T, b2)

    logits = jax.jit(dino_classifier_forward)(x, params)
    logits = jax.block_until_ready(logits)

    ref = _reference(x, params)
    assert logits.shape == (B, NUM_CLASSES), logits.shape
    assert jnp.allclose(logits, ref, atol=1e-4, rtol=1e-4), "mismatch vs reference"

    print("KERNEL_OK")
</pallas_src>

<mosaic_0001>
module attributes {stable_mosaic.version = 11 : i64} {
  func.func @dino_classifier_kernel(%arg0: i32, %arg1: memref<32x128xf32, #tpu.memory_space<vmem>>, %arg2: memref<8x32xf32, #tpu.memory_space<vmem>>, %arg3: memref<128x128xf32, #tpu.memory_space<vmem>>, %arg4: memref<1x128xf32, #tpu.memory_space<vmem>>, %arg5: memref<128x128xf32, #tpu.memory_space<vmem>>, %arg6: memref<1x128xf32, #tpu.memory_space<vmem>>, %arg7: memref<128x128xf32, #tpu.memory_space<vmem>>, %arg8: memref<1x128xf32, #tpu.memory_space<vmem>>, %arg9: memref<8x128xf32, #tpu.memory_space<vmem>>) attributes {dimension_semantics = [#tpu.dimension_semantics<arbitrary>], iteration_bounds = array<i64: 1>, scalar_prefetch = 0 : i64, scratch_operands = 0 : i64, tpu.core_type = #tpu.core_type<tc>, window_params = [{pipeline_mode = #tpu.pipeline_mode<synchronous>, transform_indices = @transform_0, window_bounds = array<i64: 32, 128>}, {pipeline_mode = #tpu.pipeline_mode<synchronous>, transform_indices = @transform_1, window_bounds = array<i64: 8, 32>}, {pipeline_mode = #tpu.pipeline_mode<synchronous>, transform_indices = @transform_2, window_bounds = array<i64: 128, 128>}, {pipeline_mode = #tpu.pipeline_mode<synchronous>, transform_indices = @transform_3, window_bounds = array<i64: 1, 128>}, {pipeline_mode = #tpu.pipeline_mode<synchronous>, transform_indices = @transform_4, window_bounds = array<i64: 128, 128>}, {pipeline_mode = #tpu.pipeline_mode<synchronous>, transform_indices = @transform_5, window_bounds = array<i64: 1, 128>}, {pipeline_mode = #tpu.pipeline_mode<synchronous>, transform_indices = @transform_6, window_bounds = array<i64: 128, 128>}, {pipeline_mode = #tpu.pipeline_mode<synchronous>, transform_indices = @transform_7, window_bounds = array<i64: 1, 128>}, {pipeline_mode = #tpu.pipeline_mode<synchronous>, transform_indices = @transform_8, window_bounds = array<i64: 8, 128>}]} {
    %c0 = arith.constant 0 : index
    %c0_0 = arith.constant 0 : index
    %0 = vector.load %arg1[%c0, %c0_0] : memref<32x128xf32, #tpu.memory_space<vmem>>, vector<32x128xf32>
    %c0_1 = arith.constant 0 : index
    %c0_2 = arith.constant 0 : index
    %1 = vector.load %arg3[%c0_1, %c0_2] : memref<128x128xf32, #tpu.memory_space<vmem>>, vector<128x128xf32>
    %cst = arith.constant dense<0.000000e+00> : vector<32x128xf32>
    %2 = tpu.matmul %0, %1, %cst {dimension_numbers = #tpu.dot_dimension_numbers<[1], [0], [0], [1], [0, 0, 1, 1], [], []>} : vector<32x128xf32>, vector<128x128xf32>, vector<32x128xf32> -> vector<32x128xf32>
    %c0_3 = arith.constant 0 : index
    %c0_4 = arith.constant 0 : index
    %3 = vector.load %arg4[%c0_3, %c0_4] : memref<1x128xf32, #tpu.memory_space<vmem>>, vector<1x128xf32>
    %4 = vector.broadcast %3 : vector<1x128xf32> to vector<32x128xf32>
    %5 = arith.addf %2, %4 : vector<32x128xf32>
    %c0_5 = arith.constant 0 : index
    %c0_6 = arith.constant 0 : index
    %6 = vector.load %arg2[%c0_5, %c0_6] : memref<8x32xf32, #tpu.memory_space<vmem>>, vector<8x32xf32>
    %cst_7 = arith.constant dense<0.000000e+00> : vector<8x128xf32>
    %7 = tpu.matmul %6, %5, %cst_7 {dimension_numbers = #tpu.dot_dimension_numbers<[1], [0], [0], [1], [0, 0, 1, 1], [], []>} : vector<8x32xf32>, vector<32x128xf32>, vector<8x128xf32> -> vector<8x128xf32>
    %c0_8 = arith.constant 0 : index
    %c0_9 = arith.constant 0 : index
    %8 = vector.load %arg5[%c0_8, %c0_9] : memref<128x128xf32, #tpu.memory_space<vmem>>, vector<128x128xf32>
    %cst_10 = arith.constant dense<0.000000e+00> : vector<8x128xf32>
    %9 = tpu.matmul %7, %8, %cst_10 {dimension_numbers = #tpu.dot_dimension_numbers<[1], [0], [0], [1], [0, 0, 1, 1], [], []>} : vector<8x128xf32>, vector<128x128xf32>, vector<8x128xf32> -> vector<8x128xf32>
    %c0_11 = arith.constant 0 : index
    %c0_12 = arith.constant 0 : index
    %10 = vector.load %arg6[%c0_11, %c0_12] : memref<1x128xf32, #tpu.memory_space<vmem>>, vector<1x128xf32>
    %11 = vector.broadcast %10 : vector<1x128xf32> to vector<8x128xf32>
    %12 = arith.addf %9, %11 : vector<8x128xf32>
    %cst_13 = arith.constant 0.000000e+00 : f32
    %13 = vector.broadcast %cst_13 : f32 to vector<8x128xf32>
    %14 = arith.maximumf %12, %13 : vector<8x128xf32>
    %c0_14 = arith.constant 0 : index
    %c0_15 = arith.constant 0 : index
    %15 = vector.load %arg7[%c0_14, %c0_15] : memref<128x128xf32, #tpu.memory_space<vmem>>, vector<128x128xf32>
    %cst_16 = arith.constant dense<0.000000e+00> : vector<8x128xf32>
    %16 = tpu.matmul %14, %15, %cst_16 {dimension_numbers = #tpu.dot_dimension_numbers<[1], [0], [0], [1], [0, 0, 1, 1], [], []>} : vector<8x128xf32>, vector<128x128xf32>, vector<8x128xf32> -> vector<8x128xf32>
    %c0_17 = arith.constant 0 : index
    %c0_18 = arith.constant 0 : index
    %17 = vector.load %arg8[%c0_17, %c0_18] : memref<1x128xf32, #tpu.memory_space<vmem>>, vector<1x128xf32>
    %18 = vector.broadcast %17 : vector<1x128xf32> to vector<8x128xf32>
    %19 = arith.addf %16, %18 : vector<8x128xf32>
    %c0_19 = arith.constant 0 : index
    %c0_20 = arith.constant 0 : index
    %20 = vector.load %arg9[%c0_19, %c0_20] : memref<8x128xf32, #tpu.memory_space<vmem>>, vector<8x128xf32>
    tpu.vector_store %arg9[%c0_19, %c0_20], %19 {strides = array<i32>} : memref<8x128xf32, #tpu.memory_space<vmem>>, vector<8x128xf32>,
    return
  }
  func.func @transform_0(%arg0: i32) -> (i32, i32) {
    %c0_i32 = arith.constant 0 : i32
    %c0_i32_0 = arith.constant 0 : i32
    %c0_i32_1 = arith.constant 0 : i32
    return %c0_i32, %c0_i32_0 : i32, i32
  }
  func.func @transform_1(%arg0: i32) -> (i32, i32) {
    %c0_i32 = arith.constant 0 : i32
    %c0_i32_0 = arith.constant 0 : i32
    %c0_i32_1 = arith.constant 0 : i32
    return %c0_i32, %c0_i32_0 : i32, i32
  }
  func.func @transform_2(%arg0: i32) -> (i32, i32) {
    %c0_i32 = arith.constant 0 : i32
    %c0_i32_0 = arith.constant 0 : i32
    %c0_i32_1 = arith.constant 0 : i32
    return %c0_i32, %c0_i32_0 : i32, i32
  }
  func.func @transform_3(%arg0: i32) -> (i32, i32) {
    %c0_i32 = arith.constant 0 : i32
    %c0_i32_0 = arith.constant 0 : i32
    %c0_i32_1 = arith.constant 0 : i32
    return %c0_i32, %c0_i32_0 : i32, i32
  }
  func.func @transform_4(%arg0: i32) -> (i32, i32) {
    %c0_i32 = arith.constant 0 : i32
    %c0_i32_0 = arith.constant 0 : i32
    %c0_i32_1 = arith.constant 0 : i32
    return %c0_i32, %c0_i32_0 : i32, i32
  }
  func.func @transform_5(%arg0: i32) -> (i32, i32) {
    %c0_i32 = arith.constant 0 : i32
    %c0_i32_0 = arith.constant 0 : i32
    %c0_i32_1 = arith.constant 0 : i32
    return %c0_i32, %c0_i32_0 : i32, i32
  }
  func.func @transform_6(%arg0: i32) -> (i32, i32) {
    %c0_i32 = arith.constant 0 : i32
    %c0_i32_0 = arith.constant 0 : i32
    %c0_i32_1 = arith.constant 0 : i32
    return %c0_i32, %c0_i32_0 : i32, i32
  }
  func.func @transform_7(%arg0: i32) -> (i32, i32) {
    %c0_i32 = arith.constant 0 : i32
    %c0_i32_0 = arith.constant 0 : i32
    %c0_i32_1 = arith.constant 0 : i32
    return %c0_i32, %c0_i32_0 : i32, i32
  }
  func.func @transform_8(%arg0: i32) -> (i32, i32) {
    %c0_i32 = arith.constant 0 : i32
    %c0_i32_0 = arith.constant 0 : i32
    %c0_i32_1 = arith.constant 0 : i32
    return %c0_i32, %c0_i32_0 : i32, i32
  }
}

</mosaic_0001>

<bundles_post_ra>
// kernel: dino_classifier_forward.1
= control target key start
LH: loop header
LB: loop body
LE: loop exit
PB: predicated region body
PF: predicated region fallthrough
CT: control target
= control target key end

     0   :  { %v592_v20 = vmov 0.0   ;;  %vm593_vm0 = vmmov 0   ;;  %vm142_vm1 = vcmask 261120   ;;  %s852_s2 = inlined_call_operand.vmem [shape: f32[128,128], index: 2, kind: input, shape index: {}]   ;;  %s853_s0 = inlined_call_operand.vmem [shape: f32[32,128], index: 0, kind: input, shape index: {}]   ;;  %s854_s3 = inlined_call_operand.vmem [shape: f32[1,128], index: 3, kind: input, shape index: {}]   ;;  %s855_s1 = inlined_call_operand.vmem [shape: f32[8,32], index: 1, kind: input, shape index: {}]   ;;  %s856_s4 = inlined_call_operand.vmem [shape: f32[128,128], index: 4, kind: input, shape index: {}]   ;;  %s857_s6 = inlined_call_operand.vmem [shape: f32[128,128], index: 6, kind: input, shape index: {}]   ;;  %s858_s5 = inlined_call_operand.vmem [shape: f32[1,128], index: 5, kind: input, shape index: {}]   ;;  %s859_s7 = inlined_call_operand.vmem [shape: f32[1,128], index: 7, kind: input, shape index: {}]   ;;  %s860_s8 = inlined_call_operand.vmem [shape: f32[8,128], index: 8, kind: output, shape index: {}]  }
   0x1   :  { %v48_v0 = vld [vmem:[%s852_s2 + $0x78] sm:$0xff]  ;;  %v47_v1 = vld [vmem:[%s852_s2 + $0x70] sm:$0xff]  ;;  %v46_v2 = vld [vmem:[%s852_s2 + $0x68] sm:$0xff]  ;;  %509 = vmatprep.subr.mxu1 %v592_v20  ;;  %517 = vmatprep.mubr.msk.f32.mxu1 %vm593_vm0, %v592_v20 }
   0x2   :  { %471 = vmatprep.subr.mxu0 %v48_v0  ;;  %v45_v3 = vld [vmem:[%s852_s2 + $0x60] sm:$0xff]  ;;  %v44_v5 = vld [vmem:[%s852_s2 + $0x58] sm:$0xff]  ;;  %v43_v6 = vld [vmem:[%s852_s2 + $0x50] sm:$0xff] }
   0x3   :  { %472 = vmatpush3.msra.mxu0 %v48_v0  ;;  %v29_v4 = vld [vmem:[%s853_s0] sm:$0xff]  ;;  %v42_v7 = vld [vmem:[%s852_s2 + $0x48] sm:$0xff]  ;;  %v40_v9 = vld [vmem:[%s852_s2 + $0x38] sm:$0xff] }
   0x4   :  { %473 = vmatprep.subr.mxu0 %v47_v1  ;;  %503 = vmatprep.mubr.f32.mxu0 %v29_v4  ;;  %v41_v8 = vld [vmem:[%s852_s2 + $0x40] sm:$0xff]  ;;  %v39_v10 = vld [vmem:[%s852_s2 + $0x30] sm:$0xff]  ;;  %v38_v11 = vld [vmem:[%s852_s2 + $0x28] sm:$0xff] }
   0x5   :  { %474 = vmatpush3.msra.mxu0 %v47_v1  ;;  %v37_v12 = vld [vmem:[%s852_s2 + $0x20] sm:$0xff]  ;;  %v36_v13 = vld [vmem:[%s852_s2 + $0x18] sm:$0xff]  ;;  %v35_v14 = vld [vmem:[%s852_s2 + $0x10] sm:$0xff] }
   0x6   :  { %475 = vmatprep.subr.mxu0 %v46_v2  ;;  %v34_v15 = vld [vmem:[%s852_s2 + $0x8] sm:$0xff]  ;;  %v33_v16 = vld [vmem:[%s852_s2] sm:$0xff]  ;;  %v31_v18 = vld [vmem:[%s853_s0 + $0x10] sm:$0xff] }
   0x7   :  { %476 = vmatpush3.msra.mxu0 %v46_v2  ;;  %v30_v17 = vld [vmem:[%s853_s0 + $0x8] sm:$0xff]  ;;  %v32_v19 = vld [vmem:[%s853_s0 + $0x18] sm:$0xff]  ;;  %v408_v23 = vld [vmem:[%s854_s3] ss:$0 sm:$0xff] }
   0x8   :  { %477 = vmatprep.subr.mxu0 %v45_v3  ;;  %v141_v30 = vld [vmem:[%s855_s1] sm:$0xff]  ;;  %v231_v31 = vld [vmem:[%s856_s4 + $0x78] sm:$0xff]  ;;  %v230_v32 = vld [vmem:[%s856_s4 + $0x70] sm:$0xff] }
   0x9   :  { %478 = vmatpush3.msra.mxu0 %v45_v3  ;;  %v229_v33 = vld [vmem:[%s856_s4 + $0x68] sm:$0xff]  ;;  %v228_v34 = vld [vmem:[%s856_s4 + $0x60] sm:$0xff]  ;;  %v227_v35 = vld [vmem:[%s856_s4 + $0x58] sm:$0xff] }
   0xa   :  { %479 = vmatprep.subr.mxu0 %v44_v5  ;;  %v226_v36 = vld [vmem:[%s856_s4 + $0x50] sm:$0xff]  ;;  %v225_v37 = vld [vmem:[%s856_s4 + $0x48] sm:$0xff]  ;;  %v224_v38 = vld [vmem:[%s856_s4 + $0x40] sm:$0xff] }
   0xb   :  { %480 = vmatpush3.msra.mxu0 %v44_v5  ;;  %v223_v39 = vld [vmem:[%s856_s4 + $0x38] sm:$0xff]  ;;  %v222_v40 = vld [vmem:[%s856_s4 + $0x30] sm:$0xff]  ;;  %v221_v41 = vld [vmem:[%s856_s4 + $0x28] sm:$0xff] }
   0xc   :  { %481 = vmatprep.subr.mxu0 %v43_v6  ;;  %v220_v42 = vld [vmem:[%s856_s4 + $0x20] sm:$0xff]  ;;  %v219_v43 = vld [vmem:[%s856_s4 + $0x18] sm:$0xff]  ;;  %v218_v44 = vld [vmem:[%s856_s4 + $0x10] sm:$0xff] }
   0xd   :  { %482 = vmatpush3.msra.mxu0 %v43_v6  ;;  %v217_v45 = vld [vmem:[%s856_s4 + $0x8] sm:$0xff]  ;;  %v216_v46 = vld [vmem:[%s856_s4] sm:$0xff]  ;;  %v325_v47 = vld [vmem:[%s857_s6 + $0x78] sm:$0xff] }
   0xe   :  { %483 = vmatprep.subr.mxu0 %v42_v7  ;;  %v324_v48 = vld [vmem:[%s857_s6 + $0x70] sm:$0xff]  ;;  %v323_v49 = vld [vmem:[%s857_s6 + $0x68] sm:$0xff]  ;;  %v322_v50 = vld [vmem:[%s857_s6 + $0x60] sm:$0xff] }
   0xf   :  { %484 = vmatpush3.msra.mxu0 %v42_v7  ;;  %v321_v51 = vld [vmem:[%s857_s6 + $0x58] sm:$0xff]  ;;  %v320_v52 = vld [vmem:[%s857_s6 + $0x50] sm:$0xff]  ;;  %v319_v53 = vld [vmem:[%s857_s6 + $0x48] sm:$0xff] }
  0x10   :  { %485 = vmatprep.subr.mxu0 %v41_v8  ;;  %v318_v54 = vld [vmem:[%s857_s6 + $0x40] sm:$0xff]  ;;  %v317_v55 = vld [vmem:[%s857_s6 + $0x38] sm:$0xff]  ;;  %v316_v56 = vld [vmem:[%s857_s6 + $0x30] sm:$0xff] }
  0x11   :  { %486 = vmatpush3.msra.mxu0 %v41_v8  ;;  %v315_v57 = vld [vmem:[%s857_s6 + $0x28] sm:$0xff]  ;;  %v314_v58 = vld [vmem:[%s857_s6 + $0x20] sm:$0xff]  ;;  %v313_v59 = vld [vmem:[%s857_s6 + $0x18] sm:$0xff] }
  0x12   :  { %487 = vmatprep.subr.mxu0 %v40_v9  ;;  %v312_v62 = vld [vmem:[%s857_s6 + $0x10] sm:$0xff]  ;;  %v311_v63 = vld [vmem:[%s857_s6 + $0x8] sm:$0xff]  ;;  %v310_v0 = vld [vmem:[%s857_s6] sm:$0xff] }
  0x13   :  { %488 = vmatpush3.msra.mxu0 %v40_v9  ;;  %v410_v1 = vld [vmem:[%s858_s5] ss:$0 sm:$0xff] }
  0x14   :  { %489 = vmatprep.subr.mxu0 %v39_v10  ;;  %v411_v6 = vld [vmem:[%s859_s7] ss:$0 sm:$0xff] }
  0x15   :  { %490 = vmatpush3.msra.mxu0 %v39_v10 }
  0x16   :  { %491 = vmatprep.subr.mxu0 %v38_v11 }
  0x17   :  { %492 = vmatpush3.msra.mxu0 %v38_v11 }
  0x18   :  { %493 = vmatprep.subr.mxu0 %v37_v12 }
  0x19   :  { %494 = vmatpush3.msra.mxu0 %v37_v12 }
  0x1a   :  { %495 = vmatprep.subr.mxu0 %v36_v13 }
  0x1b   :  { %496 = vmatpush3.msra.mxu0 %v36_v13 }
  0x1c   :  { %497 = vmatprep.subr.mxu0 %v35_v14 }
  0x1d   :  { %498 = vmatpush3.msra.mxu0 %v35_v14 }
  0x1e   :  { %499 = vmatprep.subr.mxu0 %v34_v15 }
  0x1f   :  { %500 = vmatpush3.msra.mxu0 %v34_v15 }
  0x20   :  { %501 = vmatprep.subr.mxu0 %v33_v16 }
  0x21   :  { %502 = vmatpush3.msra.mxu0 %v33_v16 }
  0x22   :  { %504 = vmatmul.mubr.f32.vlgmr.msra.gmra.mxu0 %v30_v17  ;;  %555 = vmatprep.subr.mxu0 %v592_v20 }
  0x23   :  { %506 = vmatprep.mubr.f32.mxu0 %v31_v18  ;;  %556 = vmatpush3.msra.mxu0 %v325_v47 }
  0x24   :  { %557 = vmatprep.subr.mxu0 %v592_v20 }
  0x25   :  { %558 = vmatpush3.msra.mxu0 %v324_v48 }
  0x26   :  { %507 = vmatmul.mubr.f32.gmra.mxu0 %v32_v19  ;;  %559 = vmatprep.subr.mxu0 %v592_v20 }
  0x27   :  { %587 = vmatprep.mubr.msk.f32.mxu0 %vm593_vm0, %v592_v20  ;;  %560 = vmatpush3.msra.mxu0 %v323_v49 }
  0x28   :  { %561 = vmatprep.subr.mxu0 %v592_v20 }
  0x29   :  { %562 = vmatpush3.msra.mxu0 %v322_v50 }
  0x2a   :  { %563 = vmatprep.subr.mxu0 %v592_v20 }
  0x2b   :  { %564 = vmatpush3.msra.mxu0 %v321_v51 }
  0x2c   :  { %565 = vmatprep.subr.mxu0 %v592_v20 }
  0x2d   :  { %566 = vmatpush3.msra.mxu0 %v320_v52 }
  0x2e   :  { %567 = vmatprep.subr.mxu0 %v592_v20 }
  0x2f   :  { %568 = vmatpush3.msra.mxu0 %v319_v53 }
  0x30   :  { %569 = vmatprep.subr.mxu0 %v592_v20 }
  0x31   :  { %570 = vmatpush3.msra.mxu0 %v318_v54 }
  0x32   :  { %571 = vmatprep.subr.mxu0 %v592_v20 }
  0x33   :  { %572 = vmatpush3.msra.mxu0 %v317_v55 }
  0x34   :  { %573 = vmatprep.subr.mxu0 %v592_v20 }
  0x35   :  { %574 = vmatpush3.msra.mxu0 %v316_v56 }
  0x36   :  { %575 = vmatprep.subr.mxu0 %v592_v20 }
  0x37   :  { %576 = vmatpush3.msra.mxu0 %v315_v57 }
  0x38   :  { %577 = vmatprep.subr.mxu0 %v592_v20 }
  0x39   :  { %578 = vmatpush3.msra.mxu0 %v314_v58 }
  0x3a   :  { %579 = vmatprep.subr.mxu0 %v592_v20 }
  0x3b   :  { %580 = vmatpush3.msra.mxu0 %v313_v59 }
  0x3c   :  { %581 = vmatprep.subr.mxu0 %v592_v20 }
  0x3d   :  { %582 = vmatpush3.msra.mxu0 %v312_v62 }
  0x3e   :  { %583 = vmatprep.subr.mxu0 %v592_v20 }
  0x3f   :  { %584 = vmatpush3.msra.mxu0 %v311_v63 }
  0x40   :  { %585 = vmatprep.subr.mxu0 %v592_v20 }
  0x41   :  { %586 = vmatpush3.msra.mxu0 %v310_v0 }
  0xe2   :  { %v505_v21 = vpop.f32.mrf.mxu0 }
  0xe3   :  { %v128_v28 = vadd.f32 %v505_v21, %v408_v23 }
  0xe4   :  { %v122_v22 = vpop.f32.mrf.mxu0 }
  0xe5   :  { %v123_v29 = vadd.f32 %v408_v23, %v122_v22 }
  0xe6   :  { %v508_v24 = vpop.f32.mrf.mxu0 }
  0xe7   :  { %v138_v25 = vadd.f32 %v508_v24, %v408_v23 }
  0xe8   :  { %v132_v26 = vpop.f32.mrf.mxu0 }
  0xe9   :  { %v133_v27 = vadd.f32 %v408_v23, %v132_v26  ;;  %510 = vmatpush3.msra.mxu1 %v138_v25 }
  0xea   :  { %511 = vmatprep.subr.mxu1 %v592_v20 }
  0xeb   :  { %512 = vmatpush3.msra.mxu1 %v133_v27 }
  0xec   :  { %513 = vmatprep.subr.mxu1 %v592_v20 }
  0xed   :  { %514 = vmatpush3.msra.mxu1 %v128_v28 }
  0xee   :  { %515 = vmatprep.subr.mxu1 %v592_v20 }
  0xef   :  { %516 = vmatpush3.msra.mxu1 %v123_v29 }
  0xf0   :  { %518 = vmatmul.mubr.msk.f32.vlgmr.msra.gmra.mxu1 %vm142_vm1, %v141_v30  ;;  %520 = vmatprep.subr.mxu1 %v592_v20 }
  0xf1   :  { %521 = vmatpush3.msra.mxu1 %v231_v31  ;;  %552 = vmatprep.mubr.msk.f32.mxu1 %vm593_vm0, %v592_v20 }
  0xf2   :  { %522 = vmatprep.subr.mxu1 %v592_v20 }
  0xf3   :  { %523 = vmatpush3.msra.mxu1 %v230_v32 }
  0xf4   :  { %524 = vmatprep.subr.mxu1 %v592_v20 }
  0xf5   :  { %525 = vmatpush3.msra.mxu1 %v229_v33 }
  0xf6   :  { %526 = vmatprep.subr.mxu1 %v592_v20 }
  0xf7   :  { %527 = vmatpush3.msra.mxu1 %v228_v34 }
  0xf8   :  { %528 = vmatprep.subr.mxu1 %v592_v20 }
  0xf9   :  { %529 = vmatpush3.msra.mxu1 %v227_v35 }
  0xfa   :  { %530 = vmatprep.subr.mxu1 %v592_v20 }
  0xfb   :  { %531 = vmatpush3.msra.mxu1 %v226_v36 }
  0xfc   :  { %532 = vmatprep.subr.mxu1 %v592_v20 }
  0xfd   :  { %533 = vmatpush3.msra.mxu1 %v225_v37 }
  0xfe   :  { %534 = vmatprep.subr.mxu1 %v592_v20 }
  0xff   :  { %535 = vmatpush3.msra.mxu1 %v224_v38 }
 0x100   :  { %536 = vmatprep.subr.mxu1 %v592_v20 }
 0x101   :  { %537 = vmatpush3.msra.mxu1 %v223_v39 }
 0x102   :  { %538 = vmatprep.subr.mxu1 %v592_v20 }
 0x103   :  { %539 = vmatpush3.msra.mxu1 %v222_v40 }
 0x104   :  { %540 = vmatprep.subr.mxu1 %v592_v20 }
 0x105   :  { %541 = vmatpush3.msra.mxu1 %v221_v41 }
 0x106   :  { %542 = vmatprep.subr.mxu1 %v592_v20 }
 0x107   :  { %543 = vmatpush3.msra.mxu1 %v220_v42 }
 0x108   :  { %544 = vmatprep.subr.mxu1 %v592_v20 }
 0x109   :  { %545 = vmatpush3.msra.mxu1 %v219_v43 }
 0x10a   :  { %546 = vmatprep.subr.mxu1 %v592_v20 }
 0x10b   :  { %547 = vmatpush3.msra.mxu1 %v218_v44 }
 0x10c   :  { %548 = vmatprep.subr.mxu1 %v592_v20 }
 0x10d   :  { %549 = vmatpush3.msra.mxu1 %v217_v45 }
 0x10e   :  { %550 = vmatprep.subr.mxu1 %v592_v20 }
 0x10f   :  { %551 = vmatpush3.msra.mxu1 %v216_v46 }
 0x1b0   :  { %v212_v60 = vpop.f32.mrf.mxu1 }
 0x1b1   :  { %553 = vmatmul.mubr.f32.vlgmr.msra.gmra.mxu1 %v212_v60 }
 0x1b2   :  { %v519_v61 = vpop.f32.mrf.mxu1 }
 0x271   :  { %v305_v2 = vpop.f32.mrf.mxu1 }
 0x272   :  { %v306_v3 = vadd.f32 %v410_v1, %v305_v2 }
 0x273   :  { %v554_v4 = vpop.f32.mrf.mxu1 }
 0x274   :  { %v309_v5 = vmax.f32 %v306_v3, 0.0 }
 0x276   :  { %588 = vmatmul.mubr.f32.vlgmr.msra.gmra.mxu0 %v309_v5 }
 0x336   :  { %v399_v7 = vpop.f32.mrf.mxu0 }
 0x337   :  { %v400_v8 = vadd.f32 %v411_v6, %v399_v7 }
 0x338   :  { %v589_v9 = vpop.f32.mrf.mxu0 }
 0x339   :  { %403 = vst [vmem:[%s860_s8] sm:$0xff] %v400_v8 }

</bundles_post_ra>
